<compile_context>
chip_gen: v5e
topology: v5e:2x2
jax: 0.10.0
libtpu: 0.0.40
codegen_flags: <defaults>
</compile_context>

<pallas_src>
import jax
import jax.numpy as jnp
from jax import lax
from jax.experimental import pallas as pl
from jax.experimental.pallas import tpu as pltpu


def _conv_bias_kernel(w_ref, b_ref, p_ref, o_ref):
    """Single MXU matmul + exact f32 bias epilogue per grid step.

    w_ref: (Cout16, K)  bf16 weights, K = 9*Cin
    b_ref: (Cout16, 1)  f32 bias (exact, not quantized)
    p_ref: (K, TP)      bf16 im2col patch tile (TP pixels on the lane axis)
    o_ref: (Cout16, TP) bf16 conv output tile, lane-dense
    """
    acc = jnp.dot(w_ref[...], p_ref[...], preferred_element_type=jnp.float32)
    o_ref[...] = (acc + b_ref[...]).astype(o_ref.dtype)


def _pick_pixel_tile(hw, n_batch, max_tp):
    """Largest lane-dense pixel tile (multiple of 128) under the VMEM budget.

    HW is padded up to a multiple of the tile so output stores are unmasked,
    but we never waste more than ~12.5% of HW (or one 128-lane group) on padding.
    For batch == 1, keep >= 2 grid steps so both v7x TensorCores get work.
    """
    for tp in (32768, 16384, 8192, 4096, 2048, 1024, 512, 256, 128):
        if tp > max_tp:
            continue
        hw_pad = -(-hw // tp) * tp
        if n_batch == 1 and tp > 128 and hw_pad // tp < 2:
            continue
        if hw_pad - hw <= max(hw // 8, 127):
            return tp, hw_pad
    tp = 128
    return tp, -(-hw // tp) * tp


def deconv_block(x_nchw, weight_oihw, bias, upscale=4, compute_dtype=jnp.bfloat16):
    """Forward pass equivalent to the PyTorch DeconvBlock.

    x_nchw     : (N, Cin, H, W)        float32
    weight_oihw: (Cout*16, Cin, 3, 3)  float32 (PyTorch Conv2d layout)
    bias       : (Cout*16,)            float32
    returns    : (N, Cout, H*4, W*4)   float32 (NCHW, matching PyTorch)
    """
    N, Cin, H, W = x_nchw.shape
    Cout16 = weight_oihw.shape[0]
    r = upscale
    Cout = Cout16 // (r * r)
    HW = H * W
    K = 9 * Cin  # bias NOT folded into the matmul

    # ---- XLA glue: ReflectionPad2d(1) + channel-first im2col (bf16) -------------
    xp = jnp.pad(x_nchw, ((0, 0), (0, 0), (1, 1), (1, 1)), mode="reflect")
    taps = [xp[:, :, ky:ky + H, kx:kx + W] for ky in range(3) for kx in range(3)]
    patches = jnp.concatenate(taps, axis=1).reshape(N, K, HW).astype(compute_dtype)

    # Weights OIHW -> (Cout16, 9*Cin) in (ky, kx, ci) order, matching the patch rows.
    w_t = (jnp.transpose(weight_oihw, (0, 2, 3, 1))
           .reshape(Cout16, K).astype(compute_dtype))
    b_t = bias.reshape(Cout16, 1).astype(jnp.float32)  # exact f32 bias

    # ---- Pixel-tile selection against a VMEM budget that fits all generations ----
    itemsize = jnp.dtype(compute_dtype).itemsize
    # Double-buffered per-step live bytes per pixel: output tile + patch tile.
    bytes_per_px = 2 * (Cout16 * itemsize + K * itemsize)
    vmem_budget = 24 * 1024 * 1024  # comfortably inside v7x's 64 MiB / v5e's raised limit
    max_tp = max(128, vmem_budget // bytes_per_px)
    TP, HW_pad = _pick_pixel_tile(HW, N, max_tp)
    if HW_pad != HW:
        patches = jnp.pad(patches, ((0, 0), (0, 0), (0, HW_pad - HW)))
    grid = (N, HW_pad // TP)

    cost = pl.CostEstimate(
        flops=2 * N * Cout16 * K * HW_pad,
        transcendentals=0,
        bytes_accessed=(N * K * HW_pad * itemsize          # patches read
                        + N * Cout16 * HW_pad * itemsize   # conv output write
                        + Cout16 * K * itemsize            # weights
                        + Cout16 * 4),                     # bias
    )

    conv_cf = pl.pallas_call(
        _conv_bias_kernel,
        out_shape=jax.ShapeDtypeStruct((N, Cout16, HW_pad), compute_dtype),
        grid=grid,
        in_specs=[
            # Weights / bias: full-array blocks, constant index -> fetched once, resident.
            pl.BlockSpec((Cout16, K), lambda n, j: (0, 0)),
            pl.BlockSpec((Cout16, 1), lambda n, j: (0, 0)),
            # Patch tile: one image, all K rows, TP pixels on the lane axis.
            pl.BlockSpec((None, K, TP), lambda n, j: (n, 0, j)),
        ],
        out_specs=pl.BlockSpec((None, Cout16, TP), lambda n, j: (n, 0, j)),
        compiler_params=pltpu.CompilerParams(
            dimension_semantics=("parallel", "parallel"),
            vmem_limit_bytes=32 * 1024 * 1024,
        ),
        cost_estimate=cost,
    )(w_t, b_t, patches)

    # ---- PixelShuffle(4) in bf16 (halves the round-trip bytes), cast f32 at the end.
    conv_cf = conv_cf[:, :, :HW]
    out = conv_cf.reshape(N, Cout, r, r, H, W)
    out = jnp.transpose(out, (0, 1, 4, 2, 5, 3)).reshape(N, Cout, H * r, W * r)
    return out.astype(x_nchw.dtype)


def _reference(x_nchw, weight_oihw, bias, upscale=4, quantize_dtype=None):
    """Pure-JAX reference (lax conv, channel-first). If quantize_dtype is given,
    x and weights are cast to that dtype and back to f32 to mirror the kernel's
    MXU inputs (the bias stays f32, matching the kernel's f32 epilogue)."""
    N, Cin, H, W = x_nchw.shape
    Cout16 = weight_oihw.shape[0]
    r = upscale
    Cout = Cout16 // (r * r)

    xp = jnp.pad(x_nchw, ((0, 0), (0, 0), (1, 1), (1, 1)), mode="reflect")
    w = weight_oihw
    if quantize_dtype is not None:
        xp = xp.astype(quantize_dtype).astype(jnp.float32)
        w = w.astype(quantize_dtype).astype(jnp.float32)

    conv = lax.conv_general_dilated(
        xp, w, window_strides=(1, 1), padding="VALID",
        dimension_numbers=("NCHW", "OIHW", "NCHW"),
        precision=lax.Precision.HIGHEST,
    ) + bias.reshape(1, Cout16, 1, 1)

    out = conv.reshape(N, Cout, r, r, H, W)
    return jnp.transpose(out, (0, 1, 4, 2, 5, 3)).reshape(N, Cout, H * r, W * r)


if __name__ == "__main__":
    key = jax.random.PRNGKey(0)
    kx, kw, kb = jax.random.split(key, 3)

    # Small shapes: batch=2, input_size=4, output_size=4, spatial=16
    N, Cin, H, W = 2, 4, 16, 16
    output_size = 4
    Cout16 = output_size * 16  # 64

    x = jax.random.normal(kx, (N, Cin, H, W), dtype=jnp.float32)
    weight = 0.1 * jax.random.normal(kw, (Cout16, Cin, 3, 3), dtype=jnp.float32)
    bias = 0.1 * jax.random.normal(kb, (Cout16,), dtype=jnp.float32)

    fwd = jax.jit(deconv_block)
    out = jax.block_until_ready(fwd(x, weight, bias))
    assert out.shape == (N, output_size, H * 4, W * 4), out.shape

    # Check vs a reference fed the same bf16-quantized x/w the MXU sees (f32 bias);
    # the kernel additionally rounds the conv result to bf16 before the shuffle,
    # so allow ~one bf16 ulp.
    ref_q = jax.block_until_ready(
        _reference(x, weight, bias, quantize_dtype=jnp.bfloat16)
    )
    assert jnp.allclose(out, ref_q, rtol=1e-2, atol=1e-2), float(
        jnp.max(jnp.abs(out - ref_q))
    )

    # Loose end-to-end check vs pure-f32 module semantics.
    ref = jax.block_until_ready(_reference(x, weight, bias))
    assert jnp.allclose(out, ref, rtol=5e-2, atol=5e-2), float(
        jnp.max(jnp.abs(out - ref))
    )

    print("KERNEL_OK")
</pallas_src>

<mosaic_0001>
module attributes {stable_mosaic.version = 11 : i64} {
  func.func @_conv_bias_kernel(%arg0: i32, %arg1: i32, %arg2: memref<64x36xbf16, #tpu.memory_space<vmem>>, %arg3: memref<64x1xf32, #tpu.memory_space<vmem>>, %arg4: memref<1x36x256xbf16, #tpu.memory_space<vmem>>, %arg5: memref<1x64x256xbf16, #tpu.memory_space<vmem>>) attributes {dimension_semantics = [#tpu.dimension_semantics<parallel>, #tpu.dimension_semantics<parallel>], iteration_bounds = array<i64: 2, 1>, scalar_prefetch = 0 : i64, scratch_operands = 0 : i64, tpu.core_type = #tpu.core_type<tc>, window_params = [{pipeline_mode = #tpu.pipeline_mode<synchronous>, transform_indices = @transform_0, window_bounds = array<i64: 64, 36>}, {pipeline_mode = #tpu.pipeline_mode<synchronous>, transform_indices = @transform_1, window_bounds = array<i64: 64, 1>}, {transform_indices = @transform_2, window_bounds = array<i64: 1, 36, 256>}, {transform_indices = @transform_3, window_bounds = array<i64: 1, 64, 256>}]} {
    %c0 = arith.constant 0 : index
    %c0_0 = arith.constant 0 : index
    %0 = vector.load %arg2[%c0, %c0_0] : memref<64x36xbf16, #tpu.memory_space<vmem>>, vector<64x36xbf16>
    %c0_1 = arith.constant 0 : index
    %c0_2 = arith.constant 0 : index
    %c0_3 = arith.constant 0 : index
    %1 = vector.load %arg4[%c0_1, %c0_2, %c0_3] : memref<1x36x256xbf16, #tpu.memory_space<vmem>>, vector<1x36x256xbf16>
    %2 = vector.shape_cast %1 : vector<1x36x256xbf16> to vector<36x256xbf16>
    %cst = arith.constant dense<0.000000e+00> : vector<64x256xf32>
    %3 = tpu.matmul %0, %2, %cst {dimension_numbers = #tpu.dot_dimension_numbers<[1], [0], [0], [1], [0, 0, 1, 1], [], []>} : vector<64x36xbf16>, vector<36x256xbf16>, vector<64x256xf32> -> vector<64x256xf32>
    %c0_4 = arith.constant 0 : index
    %c0_5 = arith.constant 0 : index
    %4 = vector.load %arg3[%c0_4, %c0_5] : memref<64x1xf32, #tpu.memory_space<vmem>>, vector<64x1xf32>
    %5 = vector.broadcast %4 : vector<64x1xf32> to vector<64x256xf32>
    %6 = arith.addf %3, %5 : vector<64x256xf32>
    %7 = arith.truncf %6 : vector<64x256xf32> to vector<64x256xbf16>
    %c0_6 = arith.constant 0 : index
    %c0_7 = arith.constant 0 : index
    %c0_8 = arith.constant 0 : index
    %8 = vector.load %arg5[%c0_6, %c0_7, %c0_8] : memref<1x64x256xbf16, #tpu.memory_space<vmem>>, vector<1x64x256xbf16>
    %9 = vector.shape_cast %8 : vector<1x64x256xbf16> to vector<64x256xbf16>
    %10 = vector.shape_cast %7 : vector<64x256xbf16> to vector<1x64x256xbf16>
    tpu.vector_store %arg5[%c0_6, %c0_7, %c0_8], %10 {strides = array<i32>} : memref<1x64x256xbf16, #tpu.memory_space<vmem>>, vector<1x64x256xbf16>,
    return
  }
  func.func @transform_0(%arg0: i32, %arg1: i32) -> (i32, i32) {
    %c0_i32 = arith.constant 0 : i32
    %c0_i32_0 = arith.constant 0 : i32
    %c0_i32_1 = arith.constant 0 : i32
    return %c0_i32, %c0_i32_0 : i32, i32
  }
  func.func @transform_1(%arg0: i32, %arg1: i32) -> (i32, i32) {
    %c0_i32 = arith.constant 0 : i32
    %c0_i32_0 = arith.constant 0 : i32
    %c0_i32_1 = arith.constant 0 : i32
    return %c0_i32, %c0_i32_0 : i32, i32
  }
  func.func @transform_2(%arg0: i32, %arg1: i32) -> (i32, i32, i32) {
    %c0_i32 = arith.constant 0 : i32
    %c0_i32_0 = arith.constant 0 : i32
    return %arg0, %c0_i32, %arg1 : i32, i32, i32
  }
  func.func @transform_3(%arg0: i32, %arg1: i32) -> (i32, i32, i32) {
    %c0_i32 = arith.constant 0 : i32
    %c0_i32_0 = arith.constant 0 : i32
    return %arg0, %c0_i32, %arg1 : i32, i32, i32
  }
}

</mosaic_0001>

<bundles_post_ra>
// kernel: deconv_block.1
= control target key start
LH: loop header
LB: loop body
LE: loop exit
PB: predicated region body
PF: predicated region fallthrough
CT: control target
= control target key end

     0   :  { %s637_s12 = smov 0   ;;  %s639_s13 = smov 0   ;;  %s720_s0 = inlined_call_operand.vmem [shape: bf16[64,36], index: 0, kind: input, shape index: {}]   ;;  %s721_s1 = inlined_call_operand.vmem [shape: f32[64,1], index: 1, kind: input, shape index: {}]   ;;  %s722_s2 = inlined_call_operand.vmem [shape: bf16[2,36,256], index: 2, kind: input, shape index: {}]   ;;  %s723_s3 = inlined_call_operand.vmem [shape: bf16[2,64,256], index: 3, kind: output, shape index: {}]  }
   0x1   :  { %s641_s14 = smov 0  }
   0x2 LB: > { %s25_s15 = sadd.s32 1, %s610_s13  ;;  %p502_p0 = scmp.ge.s32.totalorder %s614_s14, 1  ;;  %s614_s14 = sphi %s641_s14, %s13_s14   ;;  %s610_s13 = sphi %s639_s13, %s725_s13   ;;  %s606_s12 = sphi %s637_s12, %s724_s12  }
   0x3   : > { %p27_p1 = scmp.ge.s32.totalorder %s25_s15, 2  ;;  %p158_p2 = scmp.lt.s32.totalorder %s614_s14, 3 }
   0x5   : > { %s727_s15 = smov (%p27_p1, %s25_s15), 0  ;;  %p159_p3 = pnand %p502_p0, %p158_p2 }
   0x6   : > { %p191_p4 = scmp.lt.s32.totalorder (!%p159_p3), %s606_s12, 1 }
   0x7   : > { %162 = sbr.rel (%p159_p3) target bundleno = 196 (0xc4), region = 32 }
   0xc   : > { %v616_v0 = vmov 0   ;;  %v226_v1 = vld [vmem:[%s721_s1 + $0x10] sm:$0xff]  ;;  %v224_v2 = vld [vmem:[%s721_s1] sm:$0xff]  ;;  %s729_s12 = smov (!%p191_p4, %s606_s12), 1  ;;  %vm330_vm0 = vcmask 1041408   ;;  %v227_v10 = vld [vmem:[%s721_s1 + $0x18] sm:$0xff] }
   0xd   : > { %590 = vset.pattern.permute.xlu1 %v616_v0  ;;  %589 = vset.pattern.permute.xlu0 %v616_v0  ;;  %s563_s20 = smul.u32 40, %s729_s12  ;;  %v225_v11 = vld [vmem:[%s721_s1 + $0x8] sm:$0xff]  ;;  %v228_v14 = vld [vmem:[%s721_s1 + $0x20] sm:$0xff]  ;;  %v231_v23 = vld [vmem:[%s721_s1 + $0x38] sm:$0xff]  ;;  %vm317_vm1 = vcmask 293888   ;;  %s548_s21 = sshll.u32 %s729_s12, 6 }
   0xe   : > { %244 = vperm.xlu1 %590, %v226_v1   ;;  %234 = vperm.xlu0 %589, %v224_v2   ;;  %v230_v24 = vld [vmem:[%s721_s1 + $0x30] sm:$0xff]  ;;  %v229_v26 = vld [vmem:[%s721_s1 + $0x28] sm:$0xff]  ;;  %v549_v28 = vld [vmem:[%s720_s0] sm:$0xff]  ;;  %s701_s24 = scalar_lea.vmem %s723_s3, %s548_s21 }
   0xf   : > { %591 = vset.pattern.permute.xlu2 %v616_v0  ;;  %s198_s23 = scalar_lea.vmem %s722_s2, %s563_s20  ;;  %v551_v29 = vld [vmem:[%s720_s0 + $0x10] sm:$0xff]  ;;  %v550_v30 = vld [vmem:[%s720_s0 + $0x8] sm:$0xff]  ;;  %v552_v31 = vld [vmem:[%s720_s0 + $0x18] sm:$0xff] }
  0x10   : > { %v223_v3 = vld [vmem:[%s198_s23 + $0x20] sm:$0x33]  ;;  %v532_v6 = vld [vmem:[%s198_s23 + $0x10] sm:$0xf]  ;;  %v556_v9 = vld [vmem:[%s198_s23 + $0x14] sm:$0xf0]  ;;  %254 = vperm.xlu2 %591, %v228_v14  }
  0x11   : > { %v305_v4 = vunpack.c.l.b16 %v223_v3  ;;  %v306_v5 = vunpack.c.h.b16 %v223_v3  ;;  %v555_v12 = vld [vmem:[%s198_s23 + $0x14] sm:$0xf]  ;;  %v534_v13 = vld [vmem:[%s198_s23 + $0x18] sm:$0xf0]  ;;  %v533_v17 = vor.u32 %v556_v9, %v532_v6  ;;  %v524_v19 = vld [vmem:[%s198_s23] sm:$0xf] }
  0x12   : > { %v537_v18 = vor.u32 %v555_v12, %v534_v13  ;;  %v554_v20 = vld [vmem:[%s198_s23 + $0x4] sm:$0xf0]  ;;  %v553_v21 = vld [vmem:[%s198_s23 + $0x4] sm:$0xf]  ;;  %v526_v22 = vld [vmem:[%s198_s23 + $0x8] sm:$0xf0] }
  0x13   : > { %v311_v7 = vpack.c.b16 %v305_v4, %v305_v4  ;;  %v312_v8 = vpack.c.b16 %v306_v5, %v306_v5  ;;  %v525_v25 = vor.u32 %v554_v20, %v524_v19  ;;  %v529_v27 = vor.u32 %v553_v21, %v526_v22 }
  0x15   : > { %v332_v15 = vsel %vm330_vm0, %v311_v7, 0  ;;  %v335_v16 = vsel %vm330_vm0, %v312_v8, 0 }
  0x16   : > { %249 = vperm.xlu1 %590, %v227_v10   ;;  %239 = vperm.xlu0 %589, %v225_v11  }
  0x17   : > { %342 = vmatpush.bf16.msra.mxu0 %v332_v15  ;;  %557 = vmatpush.bf16.msra.mxu2 %v332_v15 }
  0x18   : > { %371 = vmatpush.bf16.msra.mxu1 %v335_v16  ;;  %560 = vmatpush.bf16.msra.mxu3 %v335_v16 }
  0x19   : > { %259 = vperm.xlu2 %591, %v229_v26  }
  0x1b   : > { %343 = vmatpush.bf16.msra.mxu0 %v533_v17  ;;  %558 = vmatpush.bf16.msra.mxu2 %v533_v17 }
  0x1c   : > { %372 = vmatpush.bf16.msra.mxu1 %v537_v18  ;;  %561 = vmatpush.bf16.msra.mxu3 %v537_v18 }
  0x1e   : > { %269 = vperm.xlu1 %590, %v231_v23   ;;  %264 = vperm.xlu0 %589, %v230_v24  }
  0x1f   : > { %344 = vmatpush.bf16.msra.mxu0 %v525_v25  ;;  %559 = vmatpush.bf16.msra.mxu2 %v525_v25 }
  0x20   : > { %373 = vmatpush.bf16.msra.mxu1 %v529_v27  ;;  %562 = vmatpush.bf16.msra.mxu3 %v529_v27 }
  0x22   : > { %538 = vmatmul.msk.bf16.vlgmr.msra.gmra.mxu0 %vm317_vm1, %v549_v28  ;;  %540 = vmatmul.msk.bf16.vlgmr.msra.gmra.mxu2 %vm317_vm1, %v551_v29 }
  0x23   : > { %542 = vmatmul.msk.bf16.vlgmr.msra.gmra.mxu1 %vm317_vm1, %v549_v28  ;;  %544 = vmatmul.msk.bf16.vlgmr.msra.gmra.mxu3 %vm317_vm1, %v551_v29 }
  0x32   : > { %539 = vmatmul.msk.bf16.gmra.mxu0 %vm317_vm1, %v550_v30  ;;  %541 = vmatmul.msk.bf16.gmra.mxu2 %vm317_vm1, %v552_v31 }
  0x33   : > { %543 = vmatmul.msk.bf16.gmra.mxu1 %vm317_vm1, %v550_v30  ;;  %545 = vmatmul.msk.bf16.gmra.mxu3 %vm317_vm1, %v552_v31 }
  0x6a   : > { %v255_v37 = vpop.permute.xlu2 %254 }
  0x73   : > { %v260_v51 = vpop.permute.xlu2 %259 }
  0x80   : > { %v235_v32 = vpop.permute.xlu0 %234  ;;  %v245_v47 = vpop.permute.xlu1 %244 }
  0x88   : > { %v240_v42 = vpop.permute.xlu0 %239  ;;  %v250_v61 = vpop.permute.xlu1 %249 }
  0x90   : > { %v265_v63 = vpop.permute.xlu0 %264  ;;  %v270_v10 = vpop.permute.xlu1 %269 }
  0x9f   : > { %v346_v33 = vpop.f32.mrf.mxu0 }
  0xa0   : > { %v347_v34 = vadd.f32 %v346_v33, %v235_v32  ;;  %v375_v35 = vpop.f32.mrf.mxu1 }
  0xa1   : > { %v376_v36 = vadd.f32 %v375_v35, %v235_v32 }
  0xa3   : > { %v395_v38 = vpack.c.bf16 %v376_v36, %v347_v34 }
  0xa5   : > { %403 = vst [vmem:[%s701_s24] sm:$0xff] %v395_v38  ;;  %v356_v39 = vpop.f32.mrf.mxu2 }
  0xa6   : > { %v357_v40 = vadd.f32 %v356_v39, %v255_v37  ;;  %v385_v41 = vpop.f32.mrf.mxu3 }
  0xa7   : > { %v386_v43 = vadd.f32 %v385_v41, %v255_v37  ;;  %v348_v44 = vpop.f32.mrf.mxu0 }
  0xa8   : > { %v349_v45 = vadd.f32 %v348_v44, %v240_v42  ;;  %v377_v46 = vpop.f32.mrf.mxu1 }
  0xa9   : > { %v399_v48 = vpack.c.bf16 %v386_v43, %v357_v40  ;;  %v378_v49 = vadd.f32 %v377_v46, %v240_v42 }
  0xab   : > { %407 = vst [vmem:[%s701_s24 + $0x20] sm:$0xff] %v399_v48  ;;  %v396_v50 = vpack.c.bf16 %v378_v49, %v349_v45 }
  0xad   : > { %404 = vst [vmem:[%s701_s24 + $0x8] sm:$0xff] %v396_v50  ;;  %v358_v52 = vpop.f32.mrf.mxu2 }
  0xae   : > { %v359_v53 = vadd.f32 %v358_v52, %v260_v51  ;;  %v387_v54 = vpop.f32.mrf.mxu3 }
  0xaf   : > { %v388_v55 = vadd.f32 %v387_v54, %v260_v51  ;;  %v351_v56 = vpop.f32.mrf.mxu0 }
  0xb0   : > { %v352_v57 = vadd.f32 %v351_v56, %v245_v47  ;;  %v380_v58 = vpop.f32.mrf.mxu1 }
  0xb1   : > { %v400_v59 = vpack.c.bf16 %v388_v55, %v359_v53  ;;  %v381_v60 = vadd.f32 %v380_v58, %v245_v47 }
  0xb3   : > { %408 = vst [vmem:[%s701_s24 + $0x28] sm:$0xff] %v400_v59  ;;  %v397_v62 = vpack.c.bf16 %v381_v60, %v352_v57 }
  0xb5   : > { %405 = vst [vmem:[%s701_s24 + $0x10] sm:$0xff] %v397_v62  ;;  %v361_v0 = vpop.f32.mrf.mxu2 }
  0xb6   : > { %v362_v1 = vadd.f32 %v361_v0, %v265_v63  ;;  %v390_v2 = vpop.f32.mrf.mxu3 }
  0xb7   : > { %v391_v3 = vadd.f32 %v390_v2, %v265_v63  ;;  %v353_v4 = vpop.f32.mrf.mxu0 }
  0xb8   : > { %v354_v5 = vadd.f32 %v353_v4, %v250_v61  ;;  %v382_v6 = vpop.f32.mrf.mxu1 }
  0xb9   : > { %v401_v7 = vpack.c.bf16 %v391_v3, %v362_v1  ;;  %v383_v8 = vadd.f32 %v382_v6, %v250_v61 }
  0xbb   : > { %409 = vst [vmem:[%s701_s24 + $0x30] sm:$0xff] %v401_v7  ;;  %v398_v9 = vpack.c.bf16 %v383_v8, %v354_v5 }
  0xbd   : > { %406 = vst [vmem:[%s701_s24 + $0x18] sm:$0xff] %v398_v9  ;;  %v363_v11 = vpop.f32.mrf.mxu2 }
  0xbe   : > { %v364_v12 = vadd.f32 %v363_v11, %v270_v10  ;;  %v392_v13 = vpop.f32.mrf.mxu3 }
  0xbf   : > { %v393_v14 = vadd.f32 %v392_v13, %v270_v10 }
  0xc1   : > { %v402_v15 = vpack.c.bf16 %v393_v14, %v364_v12 }
  0xc3   : > { %410 = vst [vmem:[%s701_s24 + $0x38] sm:$0xff] %v402_v15 }
  0xc4 PF: > { %s13_s14 = sadd.s32 1, %s614_s14   ;;  %s724_s12 = smov %s610_s13 }
  0xc5   : > { %p10_p5 = scmp.ge.s32.totalorder %s13_s14, 4   ;;  %s725_s13 = smov %s727_s15 }
  0xc7   :  { %12 = sbr.rel (!%p10_p5) target bundleno = 2 (0x2), region = 62 }

</bundles_post_ra>
